<compile_context>
chip_gen: v7x
topology: tpu7x:2x2x1
jax: 0.10.0
libtpu: 0.0.40
codegen_flags: <defaults>
</compile_context>

<pallas_src>
import functools

import jax
import jax.numpy as jnp
from jax.experimental import pallas as pl
from jax.experimental.pallas import tpu as pltpu


def _round_up(x, m):
    return (x + m - 1) // m * m


def _vq_main_kernel(x_ref, w_ref, w2_ref, enc_ref, idx_ref, counts_ref,
                    sse_ref, *, e_real, b_real):
    """Distances + argmin + one-hot + per-tile partial sums for one batch tile."""
    tb, ep = enc_ref.shape
    i = pl.program_id(0)

    x = x_ref[...]                                    # (tb, Dim_pad) f32
    w = w_ref[...]                                    # (E_pad, Dim_pad) f32
    w2 = w2_ref[...]                                  # (1, E_pad)  precomputed ||e||^2

    x2 = jnp.sum(x * x, axis=1, keepdims=True)        # (tb, 1)

    # x @ w^T with both operands contracted on their LAST axis: the MXU
    # consumes the codebook in its native (E, Dim) layout, no XLU transpose.
    xw = jax.lax.dot_general(
        x, w, dimension_numbers=(((1,), (1,)), ((), ())),
        preferred_element_type=jnp.float32)           # (tb, E_pad)
    # NOTE: casting x/w to bf16 here gives ~2-4x MXU throughput on v6e/v7x,
    # kept f32 so argmin tie-breaking matches the f32 torch reference.

    d = x2 + w2 - 2.0 * xw                            # (tb, E_pad)

    col = jax.lax.broadcasted_iota(jnp.int32, (tb, ep), 1)
    d = jnp.where(col < e_real, d, jnp.inf)           # padded codewords never win

    # First-occurrence argmin along the codebook axis (torch.argmin semantics).
    min_d = jnp.min(d, axis=1, keepdims=True)         # (tb, 1)
    idx = jnp.min(jnp.where(d == min_d, col, ep), axis=1, keepdims=True)

    # Zero-out padded batch rows everywhere.
    row_g = i * tb + jax.lax.broadcasted_iota(jnp.int32, (tb, 1), 0)
    valid = row_g < b_real                            # (tb, 1)

    onehot = (col == idx).astype(jnp.float32)
    enc = jnp.where(valid, onehot, 0.0)
    enc_ref[...] = enc                                # lane-dense: E_pad % 128 == 0

    idx_ref[...] = jnp.broadcast_to(jnp.where(valid, idx, 0), (tb, 128))

    # Per-tile codeword counts (row 0 of an (8, E_pad) block; rows 1..7 zero).
    counts = jnp.sum(enc, axis=0, keepdims=True)      # (1, E_pad)
    r8 = jax.lax.broadcasted_iota(jnp.int32, (8, ep), 0)
    counts_ref[...] = jnp.where(r8 == 0, counts, 0.0)

    # Per-tile sum of squared error.  min_d == ||x - e_idx||^2 exactly, so the
    # MSE for the VQ loss needs no second one-hot matmul.
    sse = jnp.sum(jnp.where(valid, min_d, 0.0))
    r = jax.lax.broadcasted_iota(jnp.int32, (8, 128), 0)
    c = jax.lax.broadcasted_iota(jnp.int32, (8, 128), 1)
    sse_ref[...] = jnp.where((r == 0) & (c == 0), sse, 0.0)


def _gather_kernel(idx_ref, emb_ref, out_ref, *, rows_per_step):
    """quantized rows = codebook[idx]; O(B*Dim) copies instead of O(B*E*Dim)."""
    i = pl.program_id(0)
    for r in range(rows_per_step):                    # static unroll, 8 rows/step
        row_idx = idx_ref[i * rows_per_step + r]      # scalar read from SMEM
        out_ref[pl.ds(r, 1), :] = emb_ref[pl.ds(row_idx, 1), :]


def vector_quantizer_forward(inputs, embeddings, commitment_cost):
    """inputs: (B, C, D, H, W) f32, embeddings: (E, C*D*H*W) f32."""
    B, C, D, H, W = inputs.shape
    dim = C * D * H * W
    E, e_dim = embeddings.shape
    assert e_dim == dim, "embedding_dim mismatch"

    flat_x = inputs.reshape(B, dim).astype(jnp.float32)
    emb = embeddings.astype(jnp.float32)

    # Pad everything to (8, 128)-friendly shapes.
    dim_p = _round_up(dim, 128)
    e_pad = _round_up(E, 128)
    tb = min(128, _round_up(B, 8))                    # batch tile
    b_pad = _round_up(B, tb)
    n_tiles = b_pad // tb

    x_pad = jnp.zeros((b_pad, dim_p), jnp.float32).at[:B, :dim].set(flat_x)
    emb_pad = jnp.zeros((e_pad, dim_p), jnp.float32).at[:E, :dim].set(emb)
    # Grid-invariant ||e||^2, hoisted once instead of recomputed per tile.
    w2 = jnp.sum(emb_pad * emb_pad, axis=1).reshape(1, e_pad)

    # Scoped-VMEM budget sized from the real working set (x2 double buffering).
    working = 4 * (2 * tb * dim_p + 2 * e_pad * dim_p + 2 * e_pad
                   + 2 * tb * e_pad + 2 * tb * 128 + 2 * 8 * e_pad + 2 * 8 * 128)
    vmem_limit = int(min(64 << 20, max(32 << 20, working + (4 << 20))))

    main = functools.partial(_vq_main_kernel, e_real=E, b_real=B)
    enc_out, idx_out, counts_out, sse_out = pl.pallas_call(
        main,
        grid=(n_tiles,),
        in_specs=[
            pl.BlockSpec((tb, dim_p), lambda i: (i, 0)),      # x tile
            pl.BlockSpec((e_pad, dim_p), lambda i: (0, 0)),   # codebook, resident
            pl.BlockSpec((1, e_pad), lambda i: (0, 0)),       # ||e||^2, resident
        ],
        out_specs=(
            pl.BlockSpec((tb, e_pad), lambda i: (i, 0)),      # one-hot encodings
            pl.BlockSpec((tb, 128), lambda i: (i, 0)),        # argmin indices
            pl.BlockSpec((8, e_pad), lambda i: (i, 0)),       # per-tile counts
            pl.BlockSpec((8, 128), lambda i: (i, 0)),         # per-tile SSE
        ),
        out_shape=(
            jax.ShapeDtypeStruct((b_pad, e_pad), jnp.float32),
            jax.ShapeDtypeStruct((b_pad, 128), jnp.int32),
            jax.ShapeDtypeStruct((n_tiles * 8, e_pad), jnp.float32),
            jax.ShapeDtypeStruct((n_tiles * 8, 128), jnp.float32),
        ),
        compiler_params=pltpu.CompilerParams(
            dimension_semantics=("parallel",),        # shard batch tiles (v7x)
            vmem_limit_bytes=vmem_limit,
        ),
    )(x_pad, emb_pad, w2)

    # Codebook-row gather via scalar prefetch: quantized = emb[argmin].
    rows = 8
    b_pad8 = _round_up(B, rows)
    idx_flat = jnp.zeros((b_pad8,), jnp.int32).at[:B].set(idx_out[:B, 0])
    gather = functools.partial(_gather_kernel, rows_per_step=rows)
    quant_pad = pl.pallas_call(
        gather,
        grid_spec=pltpu.PrefetchScalarGridSpec(
            num_scalar_prefetch=1,
            grid=(b_pad8 // rows,),
            in_specs=[pl.BlockSpec((e_pad, dim_p), lambda i, idx_ref: (0, 0))],
            out_specs=pl.BlockSpec((rows, dim_p), lambda i, idx_ref: (i, 0)),
        ),
        out_shape=jax.ShapeDtypeStruct((b_pad8, dim_p), jnp.float32),
        compiler_params=pltpu.CompilerParams(
            dimension_semantics=("arbitrary",),
            vmem_limit_bytes=vmem_limit,
        ),
    )(idx_flat, emb_pad)

    quantized = quant_pad[:B, :dim].reshape(B, C, D, H, W)
    encodings = enc_out[:B, :E]

    # Finalize the tiny global reductions in the wrapper (per-tile partials).
    counts = jnp.sum(counts_out, axis=0)[:E]                  # (E,)
    avg_probs = counts / B
    perplexity = jnp.exp(-jnp.sum(avg_probs * jnp.log(avg_probs + 1e-10)))
    mse = jnp.sum(sse_out) / (B * dim)
    # forward values of q_latent_loss and e_latent_loss are identical
    loss = (1.0 + commitment_cost) * mse

    return loss, quantized, perplexity, encodings


if __name__ == "__main__":
    # small shapes consistent with the module: inputs (B, C, D, H, W),
    # embedding_dim = C*D*H*W
    B, C, D, H, W = 2, 4, 4, 4, 4
    num_embeddings = 64
    embedding_dim = C * D * H * W
    commitment_cost = 0.25

    key = jax.random.PRNGKey(0)
    k_in, k_emb = jax.random.split(key)

    inputs = jax.random.normal(k_in, (B, C, D, H, W), dtype=jnp.float32)

    # deterministic init matching nn.Embedding init in the module:
    # uniform(-1/num_embeddings, +1/num_embeddings)
    limit = 1.0 / num_embeddings
    embeddings = jax.random.uniform(
        k_emb, (num_embeddings, embedding_dim),
        minval=-limit, maxval=limit, dtype=jnp.float32)

    loss, quantized, perplexity, encodings = vector_quantizer_forward(
        inputs, embeddings, commitment_cost)
    jax.block_until_ready((loss, quantized, perplexity, encodings))

    # lightweight sanity checks against a plain-JAX reference
    flat_x = inputs.reshape(B, -1)
    dist = (jnp.sum(flat_x ** 2, 1, keepdims=True)
            + jnp.sum(embeddings ** 2, 1)
            - 2.0 * jnp.dot(flat_x, embeddings.T,
                            preferred_element_type=jnp.float32))
    idx_ref = jnp.argmin(dist, axis=1)
    enc_ref = jax.nn.one_hot(idx_ref, num_embeddings, dtype=jnp.float32)
    q_ref = embeddings[idx_ref].reshape(inputs.shape)
    mse_ref = jnp.mean((q_ref - inputs) ** 2)
    loss_ref = (1.0 + commitment_cost) * mse_ref
    avg = jnp.mean(enc_ref, axis=0)
    perp_ref = jnp.exp(-jnp.sum(avg * jnp.log(avg + 1e-10)))

    assert jnp.allclose(encodings, enc_ref)
    assert jnp.allclose(quantized, q_ref, atol=1e-5)
    assert jnp.allclose(loss, loss_ref, atol=1e-5)
    assert jnp.allclose(perplexity, perp_ref, atol=1e-5)

    print("KERNEL_OK")
</pallas_src>

<mosaic_0001>
module attributes {stable_mosaic.version = 11 : i64} {
  func.func @_vq_main_kernel(%arg0: i32, %arg1: memref<8x256xf32, #tpu.memory_space<vmem>>, %arg2: memref<128x256xf32, #tpu.memory_space<vmem>>, %arg3: memref<1x128xf32, #tpu.memory_space<vmem>>, %arg4: memref<8x128xf32, #tpu.memory_space<vmem>>, %arg5: memref<8x128xi32, #tpu.memory_space<vmem>>, %arg6: memref<8x128xf32, #tpu.memory_space<vmem>>, %arg7: memref<8x128xf32, #tpu.memory_space<vmem>>) attributes {dimension_semantics = [#tpu.dimension_semantics<parallel>], iteration_bounds = array<i64: 1>, scalar_prefetch = 0 : i64, scratch_operands = 0 : i64, tpu.core_type = #tpu.core_type<tc>, window_params = [{transform_indices = @transform_0, window_bounds = array<i64: 8, 256>}, {pipeline_mode = #tpu.pipeline_mode<synchronous>, transform_indices = @transform_1, window_bounds = array<i64: 128, 256>}, {pipeline_mode = #tpu.pipeline_mode<synchronous>, transform_indices = @transform_2, window_bounds = array<i64: 1, 128>}, {transform_indices = @transform_3, window_bounds = array<i64: 8, 128>}, {transform_indices = @transform_4, window_bounds = array<i64: 8, 128>}, {transform_indices = @transform_5, window_bounds = array<i64: 8, 128>}, {transform_indices = @transform_6, window_bounds = array<i64: 8, 128>}]} {
    %c0 = arith.constant 0 : index
    %c0_0 = arith.constant 0 : index
    %0 = vector.load %arg1[%c0, %c0_0] : memref<8x256xf32, #tpu.memory_space<vmem>>, vector<8x256xf32>
    %c0_1 = arith.constant 0 : index
    %c0_2 = arith.constant 0 : index
    %1 = vector.load %arg2[%c0_1, %c0_2] : memref<128x256xf32, #tpu.memory_space<vmem>>, vector<128x256xf32>
    %c0_3 = arith.constant 0 : index
    %c0_4 = arith.constant 0 : index
    %2 = vector.load %arg3[%c0_3, %c0_4] : memref<1x128xf32, #tpu.memory_space<vmem>>, vector<1x128xf32>
    %3 = arith.mulf %0, %0 : vector<8x256xf32>
    %cst = arith.constant dense<0.000000e+00> : vector<8xf32>
    %4 = vector.multi_reduction <add>, %3, %cst [1] : vector<8x256xf32> to vector<8xf32>
    %5 = vector.shape_cast %4 : vector<8xf32> to vector<8x1xf32>
    %cst_5 = arith.constant dense<0.000000e+00> : vector<8x128xf32>
    %6 = tpu.matmul %0, %1, %cst_5 {dimension_numbers = #tpu.dot_dimension_numbers<[1], [1], [0], [0], [0, 0, 1, 0], [], []>} : vector<8x256xf32>, vector<128x256xf32>, vector<8x128xf32> -> vector<8x128xf32>
    %7 = vector.broadcast %5 : vector<8x1xf32> to vector<8x128xf32>
    %8 = vector.broadcast %2 : vector<1x128xf32> to vector<8x128xf32>
    %9 = arith.addf %7, %8 : vector<8x128xf32>
    %cst_6 = arith.constant 2.000000e+00 : f32
    %10 = vector.broadcast %cst_6 : f32 to vector<8x128xf32>
    %11 = arith.mulf %10, %6 : vector<8x128xf32>
    %12 = arith.subf %9, %11 : vector<8x128xf32>
    %13 = tpu.iota {dimensions = array<i32: 1>} : vector<8x128xi32>
    %c64_i32 = arith.constant 64 : i32
    %14 = vector.broadcast %c64_i32 : i32 to vector<8x128xi32>
    %15 = arith.cmpi slt, %13, %14 : vector<8x128xi32>
    %cst_7 = arith.constant 0x7F800000 : f32
    %16 = vector.broadcast %cst_7 : f32 to vector<8x128xf32>
    %17 = arith.select %15, %12, %16 : vector<8x128xi1>, vector<8x128xf32>
    %cst_8 = arith.constant dense<0x7F800000> : vector<8xf32>
    %18 = vector.multi_reduction <minimumf>, %17, %cst_8 [1] : vector<8x128xf32> to vector<8xf32>
    %19 = vector.shape_cast %18 : vector<8xf32> to vector<8x1xf32>
    %20 = vector.broadcast %19 : vector<8x1xf32> to vector<8x128xf32>
    %21 = arith.cmpf oeq, %17, %20 : vector<8x128xf32>
    %c128_i32 = arith.constant 128 : i32
    %22 = vector.broadcast %c128_i32 : i32 to vector<8x128xi32>
    %23 = arith.select %21, %13, %22 : vector<8x128xi1>, vector<8x128xi32>
    %cst_9 = arith.constant dense<2147483647> : vector<8xi32>
    %24 = vector.multi_reduction <minsi>, %23, %cst_9 [1] : vector<8x128xi32> to vector<8xi32>
    %25 = vector.shape_cast %24 : vector<8xi32> to vector<8x1xi32>
    %c8_i32 = arith.constant 8 : i32
    %26 = arith.muli %arg0, %c8_i32 : i32
    %27 = tpu.iota {dimensions = array<i32: 0>} : vector<8x1xi32>
    %28 = vector.broadcast %26 : i32 to vector<8x1xi32>
    %29 = arith.addi %28, %27 : vector<8x1xi32>
    %c2_i32 = arith.constant 2 : i32
    %30 = vector.broadcast %c2_i32 : i32 to vector<8x1xi32>
    %31 = arith.cmpi slt, %29, %30 : vector<8x1xi32>
    %32 = vector.broadcast %25 : vector<8x1xi32> to vector<8x128xi32>
    %33 = arith.cmpi eq, %13, %32 : vector<8x128xi32>
    %34 = arith.extui %33 : vector<8x128xi1> to vector<8x128xi32>
    %35 = arith.sitofp %34 : vector<8x128xi32> to vector<8x128xf32>
    %cst_10 = arith.constant 0.000000e+00 : f32
    %36 = vector.shape_cast %31 : vector<8x1xi1> to vector<8x1xi1>
    %37 = vector.broadcast %36 : vector<8x1xi1> to vector<8x128xi1>
    %38 = vector.broadcast %cst_10 : f32 to vector<8x128xf32>
    %39 = arith.select %37, %35, %38 : vector<8x128xi1>, vector<8x128xf32>
    %c0_11 = arith.constant 0 : index
    %c0_12 = arith.constant 0 : index
    %40 = vector.load %arg4[%c0_11, %c0_12] : memref<8x128xf32, #tpu.memory_space<vmem>>, vector<8x128xf32>
    tpu.vector_store %arg4[%c0_11, %c0_12], %39 {strides = array<i32>} : memref<8x128xf32, #tpu.memory_space<vmem>>, vector<8x128xf32>,
    %c0_i32 = arith.constant 0 : i32
    %41 = vector.broadcast %c0_i32 : i32 to vector<8x1xi32>
    %42 = arith.select %31, %25, %41 : vector<8x1xi1>, vector<8x1xi32>
    %43 = vector.shape_cast %42 : vector<8x1xi32> to vector<8x1xi32>
    %44 = vector.broadcast %43 : vector<8x1xi32> to vector<8x128xi32>
    %c0_13 = arith.constant 0 : index
    %c0_14 = arith.constant 0 : index
    %45 = vector.load %arg5[%c0_13, %c0_14] : memref<8x128xi32, #tpu.memory_space<vmem>>, vector<8x128xi32>
    tpu.vector_store %arg5[%c0_13, %c0_14], %44 {strides = array<i32>} : memref<8x128xi32, #tpu.memory_space<vmem>>, vector<8x128xi32>,
    %cst_15 = arith.constant dense<0.000000e+00> : vector<128xf32>
    %46 = vector.multi_reduction <add>, %39, %cst_15 [0] : vector<8x128xf32> to vector<128xf32>
    %47 = vector.shape_cast %46 : vector<128xf32> to vector<1x128xf32>
    %48 = tpu.iota {dimensions = array<i32: 0>} : vector<8x128xi32>
    %c0_i32_16 = arith.constant 0 : i32
    %49 = vector.broadcast %c0_i32_16 : i32 to vector<8x128xi32>
    %50 = arith.cmpi eq, %48, %49 : vector<8x128xi32>
    %cst_17 = arith.constant 0.000000e+00 : f32
    %51 = vector.shape_cast %47 : vector<1x128xf32> to vector<1x128xf32>
    %52 = vector.broadcast %51 : vector<1x128xf32> to vector<8x128xf32>
    %53 = vector.broadcast %cst_17 : f32 to vector<8x128xf32>
    %54 = arith.select %50, %52, %53 : vector<8x128xi1>, vector<8x128xf32>
    %c0_18 = arith.constant 0 : index
    %c0_19 = arith.constant 0 : index
    %55 = vector.load %arg6[%c0_18, %c0_19] : memref<8x128xf32, #tpu.memory_space<vmem>>, vector<8x128xf32>
    tpu.vector_store %arg6[%c0_18, %c0_19], %54 {strides = array<i32>} : memref<8x128xf32, #tpu.memory_space<vmem>>, vector<8x128xf32>,
    %cst_20 = arith.constant 0.000000e+00 : f32
    %56 = vector.broadcast %cst_20 : f32 to vector<8x1xf32>
    %57 = arith.select %31, %19, %56 : vector<8x1xi1>, vector<8x1xf32>
    %58 = vector.shape_cast %57 : vector<8x1xf32> to vector<1x8x1xf32>
    %cst_21 = arith.constant dense<0.000000e+00> : vector<1xf32>
    %59 = vector.multi_reduction <add>, %58, %cst_21 [1, 2] : vector<1x8x1xf32> to vector<1xf32>
    %60 = vector.shape_cast %59 : vector<1xf32> to vector<1x1x1xf32>
    %61 = vector.extract %60[0, 0, 0] : f32 from vector<1x1x1xf32>
    %62 = tpu.iota {dimensions = array<i32: 0>} : vector<8x128xi32>
    %63 = tpu.iota {dimensions = array<i32: 1>} : vector<8x128xi32>
    %c0_i32_22 = arith.constant 0 : i32
    %64 = vector.broadcast %c0_i32_22 : i32 to vector<8x128xi32>
    %65 = arith.cmpi eq, %62, %64 : vector<8x128xi32>
    %c0_i32_23 = arith.constant 0 : i32
    %66 = vector.broadcast %c0_i32_23 : i32 to vector<8x128xi32>
    %67 = arith.cmpi eq, %63, %66 : vector<8x128xi32>
    %68 = arith.andi %65, %67 : vector<8x128xi1>
    %cst_24 = arith.constant 0.000000e+00 : f32
    %69 = vector.broadcast %61 : f32 to vector<8x128xf32>
    %70 = vector.broadcast %cst_24 : f32 to vector<8x128xf32>
    %71 = arith.select %68, %69, %70 : vector<8x128xi1>, vector<8x128xf32>
    %c0_25 = arith.constant 0 : index
    %c0_26 = arith.constant 0 : index
    %72 = vector.load %arg7[%c0_25, %c0_26] : memref<8x128xf32, #tpu.memory_space<vmem>>, vector<8x128xf32>
    tpu.vector_store %arg7[%c0_25, %c0_26], %71 {strides = array<i32>} : memref<8x128xf32, #tpu.memory_space<vmem>>, vector<8x128xf32>,
    return
  }
  func.func @transform_0(%arg0: i32) -> (i32, i32) {
    %c0_i32 = arith.constant 0 : i32
    %c0_i32_0 = arith.constant 0 : i32
    return %arg0, %c0_i32 : i32, i32
  }
  func.func @transform_1(%arg0: i32) -> (i32, i32) {
    %c0_i32 = arith.constant 0 : i32
    %c0_i32_0 = arith.constant 0 : i32
    %c0_i32_1 = arith.constant 0 : i32
    return %c0_i32, %c0_i32_0 : i32, i32
  }
  func.func @transform_2(%arg0: i32) -> (i32, i32) {
    %c0_i32 = arith.constant 0 : i32
    %c0_i32_0 = arith.constant 0 : i32
    %c0_i32_1 = arith.constant 0 : i32
    return %c0_i32, %c0_i32_0 : i32, i32
  }
  func.func @transform_3(%arg0: i32) -> (i32, i32) {
    %c0_i32 = arith.constant 0 : i32
    %c0_i32_0 = arith.constant 0 : i32
    return %arg0, %c0_i32 : i32, i32
  }
  func.func @transform_4(%arg0: i32) -> (i32, i32) {
    %c0_i32 = arith.constant 0 : i32
    %c0_i32_0 = arith.constant 0 : i32
    return %arg0, %c0_i32 : i32, i32
  }
  func.func @transform_5(%arg0: i32) -> (i32, i32) {
    %c0_i32 = arith.constant 0 : i32
    %c0_i32_0 = arith.constant 0 : i32
    return %arg0, %c0_i32 : i32, i32
  }
  func.func @transform_6(%arg0: i32) -> (i32, i32) {
    %c0_i32 = arith.constant 0 : i32
    %c0_i32_0 = arith.constant 0 : i32
    return %arg0, %c0_i32 : i32, i32
  }
}

</mosaic_0001>

<bundles_post_ra>
// kernel: tpu_custom_call.1
= control target key start
LH: loop header
LB: loop body
LE: loop exit
PB: predicated region body
PF: predicated region fallthrough
CT: control target
= control target key end

     0   :  { %12 = vsyncpa [#allocation3], 0  ;;  %s626_s0 = inlined_call_operand.hbm [shape: f32[8,256], index: 0, kind: input, shape index: {}]   ;;  %s627_s1 = inlined_call_operand.hbm [shape: f32[128,256], index: 1, kind: input, shape index: {}]   ;;  %s628_s2 = inlined_call_operand.vmem [shape: f32[1,128], index: 2, kind: input, shape index: {}]   ;;  %s629_s3 = inlined_call_operand.hbm [shape: f32[8,128], index: 3, kind: output, shape index: {0}]   ;;  %s630_s4 = inlined_call_operand.hbm [shape: s32[8,128], index: 4, kind: output, shape index: {1}]   ;;  %s631_s5 = inlined_call_operand.hbm [shape: f32[8,128], index: 5, kind: output, shape index: {2}]   ;;  %s632_s6 = inlined_call_operand.hbm [shape: f32[8,128], index: 6, kind: output, shape index: {3}]  }
   0x1   :  { %13 = vsyncpa [#allocation6], 0 }
   0x2   :  { %14 = vsyncpa [#allocation4], 0 }
   0x3   :  { %15 = vsyncpa [#allocation9], 0 }
   0x4   :  { %16 = vsyncpa [#allocation12], 0  ;;  %s473_s21 = smov [#allocation2]   ;;  %s474_s23 = smov [#allocation5]  }
   0x5   :  { %s23_s22 = sshll.u32 %s473_s21, 4  ;;  %s32_s24 = sshll.u32 %s474_s23, 4  ;;  %s24_s22 = int_to_ptr.vmem [resolvable:$true] %s23_s22  ;;  %s517_s24 = int_to_ptr.vmem [resolvable:$true] %s32_s24 }
   0x6   :  { %s331_s27 = scalar_lea.hbm %s626_s0, 256 }
   0x7   :  { %p332_p0 = scmp.ne.s32.totalorder %s626_s0, %s331_s27  ;;  %p335_p1 = scmp.lt.u32.totalorder %s331_s27, %s626_s0 }
   0x9   :  { %p337_p2 = pnand %p335_p1, %p332_p0 }
   0xb   :  { %340 = shalt.err (!%p337_p2)
}
   0xc   :  { %s341_s8 = scalar_lea.vmem %s24_s22, 256  ;;  %p346_p4 = scmp.lt.s32.totalorder %s24_s22, %s24_s22 }
   0xd   :  { %p342_p3 = scmp.ne.s32.totalorder %s24_s22, %s341_s8  ;;  %p347_p5 = scmp.lt.s32.totalorder %s341_s8, %s341_s8 }
   0xf   :  { %p348_p6 = por %p347_p5, %p346_p4 }
  0x11   :  { %p349_p7 = pnand %p348_p6, %p342_p3 }
  0x13   :  { %352 = shalt.err (!%p349_p7)
}
  0x14   :  { %26 = dma.hbm_to_vmem [thread:$0]  %s626_s0, 256, %s24_s22, [#allocation3]  }
  0x15   :  { %s353_s13 = scalar_lea.hbm %s627_s1, 4096 }
  0x16   :  { %p354_p8 = scmp.ne.s32.totalorder %s627_s1, %s353_s13  ;;  %p357_p9 = scmp.lt.u32.totalorder %s353_s13, %s627_s1 }
  0x18   :  { %p359_p10 = pnand %p357_p9, %p354_p8 }
  0x1a   :  { %362 = shalt.err (!%p359_p10)
}
  0x1b   :  { %s363_s18 = scalar_lea.vmem %s517_s24, 4096  ;;  %p368_p12 = scmp.lt.s32.totalorder %s517_s24, %s517_s24 }
  0x1c   :  { %p364_p11 = scmp.ne.s32.totalorder %s517_s24, %s363_s18  ;;  %p369_p13 = scmp.lt.s32.totalorder %s363_s18, %s363_s18 }
  0x1e   :  { %p370_p0 = por %p369_p13, %p368_p12 }
  0x20   :  { %p371_p1 = pnand %p370_p0, %p364_p11 }
  0x22   :  { %374 = shalt.err (!%p371_p1)
}
  0x23   :  { %s475_s0 = smov 256   ;;  %s476_s19 = smov 16  }
  0x24   :  { %38 = dma.hbm_to_vmem [thread:$0]  %s627_s1, 4096, %s517_s24, [#allocation6], %s475_s0, %s475_s0, %s476_s19  }
  0x25   :  { %463 = dma.done.wait [#allocation3], 256  }
  0x26   :  { %464 = vsyncadd [#allocation3], 4294967040 }
  0x27   :  { %465 = dma.done.wait [#allocation6], 4096  }
  0x28   :  { %466 = vsyncadd [#allocation6], 4294963200  ;;  %v50_v0 = vld [vmem:[#allocation5 + $0x8] sm:$0xff]  ;;  %v52_v1 = vld [vmem:[#allocation5 + $0x18] sm:$0xff]  ;;  %v166_v53 = vlaneseq  ;;  %vm213_vm3 = vcmask 7168  }
  0x29   :  { %v49_v2 = vld [vmem:[#allocation5] sm:$0xff]  ;;  %v288_v3 = vpack.c.bf16 %v52_v1, %v50_v0  ;;  %v51_v4 = vld [vmem:[#allocation5 + $0x10] sm:$0xff]  ;;  %v54_v5 = vld [vmem:[#allocation5 + $0x28] sm:$0xff] }
  0x2a   :  { %v56_v6 = vld [vmem:[#allocation5 + $0x38] sm:$0xff]  ;;  %v290_v7 = vpack.c.bf16 %v51_v4, %v49_v2  ;;  %v53_v9 = vld [vmem:[#allocation5 + $0x20] sm:$0xff]  ;;  %v55_v10 = vld [vmem:[#allocation5 + $0x30] sm:$0xff]  ;;  %v551_v56 = vand.u32 127, %v166_v53  ;;  %v554_v0 = vshrl.u32 %v166_v53, 7 }
  0x2b   :  { %v292_v8 = vpack.c.bf16 %v56_v6, %v54_v5  ;;  %289 = vmatprep.subr.bf16.mxu0 %v288_v3  ;;  %v58_v11 = vld [vmem:[#allocation5 + $0x48] sm:$0xff]  ;;  %v60_v12 = vld [vmem:[#allocation5 + $0x58] sm:$0xff]  ;;  %v294_v13 = vpack.c.bf16 %v55_v10, %v53_v9  ;;  %v47_v17 = vld [vmem:[#allocation2] sm:$0xff] }
  0x2c   :  { %291 = vmatpush1.bf16.xpose.msra.mxu0 %v290_v7  ;;  %v296_v14 = vpack.c.bf16 %v60_v12, %v58_v11  ;;  %v48_v15 = vld [vmem:[#allocation2 + $0x8] sm:$0xff]  ;;  %v82_v18 = vmul.f32 %v47_v17, %v47_v17  ;;  %v57_v19 = vld [vmem:[#allocation5 + $0x40] sm:$0xff]  ;;  %v59_v20 = vld [vmem:[#allocation5 + $0x50] sm:$0xff]  ;;  %vm168_vm0 = vcmp.lt.s32.totalorder %v551_v56, 64  ;;  %vm193_vm2 = vcmp.lt.s32.totalorder %v554_v0, 2 }
  0x2d   :  { %293 = vmatprep.subr.bf16.mxu0 %v292_v8  ;;  %v83_v16 = vmul.f32 %v48_v15, %v48_v15  ;;  %151 = vmatprep.mubr.f32.mxu0 %v48_v15  ;;  %v62_v21 = vld [vmem:[#allocation5 + $0x68] sm:$0xff]  ;;  %v64_v22 = vld [vmem:[#allocation5 + $0x78] sm:$0xff]  ;;  %v298_v24 = vpack.c.bf16 %v59_v20, %v57_v19  ;;  %v61_v26 = vld [vmem:[#allocation5 + $0x60] sm:$0xff]  ;;  %vm209_vm5 = vcmp.eq.s32.totalorder %v554_v0, 0  ;;  %vm224_vm6 = vcmp.eq.s32.totalorder %v551_v56, 0 }
  0x2e   :  { %v300_v25 = vpack.c.bf16 %v64_v22, %v62_v21  ;;  %v63_v27 = vld [vmem:[#allocation5 + $0x70] sm:$0xff]  ;;  %v66_v28 = vld [vmem:[#allocation5 + $0x88] sm:$0xff]  ;;  %v68_v29 = vld [vmem:[#allocation5 + $0x98] sm:$0xff] }
  0x2f   :  { %v84_v23 = vadd.f32 %v83_v16, %v82_v18  ;;  %v302_v30 = vpack.c.bf16 %v63_v27, %v61_v26  ;;  %v304_v31 = vpack.c.bf16 %v68_v29, %v66_v28  ;;  %v65_v32 = vld [vmem:[#allocation5 + $0x80] sm:$0xff]  ;;  %v67_v33 = vld [vmem:[#allocation5 + $0x90] sm:$0xff]  ;;  %v70_v34 = vld [vmem:[#allocation5 + $0xa8] sm:$0xff] }
  0x30   :  { %v72_v35 = vld [vmem:[#allocation5 + $0xb8] sm:$0xff]  ;;  %v306_v36 = vpack.c.bf16 %v67_v33, %v65_v32  ;;  %v69_v38 = vld [vmem:[#allocation5 + $0xa0] sm:$0xff]  ;;  %v71_v39 = vld [vmem:[#allocation5 + $0xb0] sm:$0xff] }
  0x31   :  { %85 = vadd.xlane.f32.xlu0 %v84_v23  ;;  %v308_v37 = vpack.c.bf16 %v72_v35, %v70_v34  ;;  %v74_v40 = vld [vmem:[#allocation5 + $0xc8] sm:$0xff]  ;;  %v76_v41 = vld [vmem:[#allocation5 + $0xd8] sm:$0xff]  ;;  %v310_v42 = vpack.c.bf16 %v71_v39, %v69_v38  ;;  %v73_v44 = vld [vmem:[#allocation5 + $0xc0] sm:$0xff] }
  0x32   :  { %v312_v43 = vpack.c.bf16 %v76_v41, %v74_v40  ;;  %v75_v45 = vld [vmem:[#allocation5 + $0xd0] sm:$0xff]  ;;  %v78_v46 = vld [vmem:[#allocation5 + $0xe8] sm:$0xff]  ;;  %v80_v47 = vld [vmem:[#allocation5 + $0xf8] sm:$0xff] }
  0x33   :  { %v314_v48 = vpack.c.bf16 %v75_v45, %v73_v44  ;;  %v316_v49 = vpack.c.bf16 %v80_v47, %v78_v46  ;;  %v77_v50 = vld [vmem:[#allocation5 + $0xe0] sm:$0xff]  ;;  %v79_v51 = vld [vmem:[#allocation5 + $0xf0] sm:$0xff]  ;;  %vm225_vm7 = vmand %vm209_vm5, %vm224_vm6 }
  0x34   :  { %295 = vmatpush1.bf16.xpose.msra.mxu0 %v294_v13  ;;  %v318_v52 = vpack.c.bf16 %v79_v51, %v77_v50  ;;  %v286_v54 = vld [vmem:[%s628_s2] ss:$0 sm:$0xff]  ;;  %s477_s2 = smov [#allocation11]  }
  0x35   :  { %297 = vmatprep.subr.bf16.mxu0 %v296_v14  ;;  %s265_s23 = sshll.u32 %s477_s2, 4  ;;  %s266_s23 = int_to_ptr.vmem [resolvable:$true] %s265_s23 }
  0x36   :  { %s375_s25 = scalar_lea.vmem %s266_s23, 128  ;;  %p380_p3 = scmp.lt.s32.totalorder %s266_s23, %s266_s23 }
  0x37   :  { %p376_p2 = scmp.ne.s32.totalorder %s266_s23, %s375_s25  ;;  %p381_p4 = scmp.lt.s32.totalorder %s375_s25, %s375_s25 }
  0x39   :  { %p382_p5 = por %p381_p4, %p380_p3 }
  0x3b   :  { %p383_p6 = pnand %p382_p5, %p376_p2 }
  0x3c   :  { %299 = vmatpush1.bf16.xpose.msra.mxu0 %v298_v24 }
  0x3d   :  { %301 = vmatprep.subr.bf16.mxu0 %v300_v25 }
  0x44   :  { %303 = vmatpush1.bf16.xpose.msra.mxu0 %v302_v30 }
  0x45   :  { %305 = vmatprep.subr.bf16.mxu0 %v304_v31 }
  0x4c   :  { %307 = vmatpush1.bf16.xpose.msra.mxu0 %v306_v36 }
  0x4d   :  { %309 = vmatprep.subr.bf16.mxu0 %v308_v37 }
  0x54   :  { %311 = vmatpush1.bf16.xpose.msra.mxu0 %v310_v42 }
  0x55   :  { %313 = vmatprep.subr.bf16.mxu0 %v312_v43 }
  0x5c   :  { %315 = vmatpush1.bf16.xpose.msra.mxu0 %v314_v48 }
  0x5d   :  { %317 = vmatprep.subr.bf16.mxu0 %v316_v49 }
  0x64   :  { %319 = vmatpush1.bf16.xpose.msra.mxu0 %v318_v52 }
  0x6b   :  { %152 = vmatmul.mubr.f32.vlgmr.msra.gmra.mrb[0].mxu0 %v47_v17 }
  0xbe   :  { %v86_v55 = vpop.xlane.xlu0 %85 }
  0xbf   :  { %v163_v57 = vadd.f32 %v286_v54, %v86_v55 }
 0x13e   :  { %v153_v58 = vpop.f32.mrb[0].mxu0 }
 0x13f   :  { %v164_v59 = vmul.f32 2.0, %v153_v58  ;;  %v155_v60 = vpop.f32.mrb[1].mxu0 }
 0x141   :  { %v165_v61 = vsub.f32 %v163_v57, %v164_v59 }
 0x143   :  { %v169_v62 = vsel %vm168_vm0, %v165_v61, inf }
 0x144   :  { %170 = vmin.xlane.f32.xlu0 %v169_v62 }
 0x1d1   :  { %v171_v63 = vpop.xlane.xlu0 %170 }
 0x1d2   :  { %vm172_vm1 = vcmp.eq.f32.partialorder %v169_v62, %v171_v63  ;;  %v212_v4 = vsel %vm193_vm2, %v171_v63, 0.0 }
 0x1d3   :  { %v173_v1 = vsel %vm172_vm1, %v551_v56, 128  ;;  %v214_v5 = vsel %vm213_vm3, %v212_v4, 0.0 }
 0x1d4   :  { %v175_v2 = vshra.s32 %v173_v1, 16  ;;  %v174_v6 = vand.u32 65535, %v173_v1 }
 0x1d6   :  { %v177_v3 = vcvt.s32.f32 %v175_v2  ;;  %v176_v8 = vcvt.s32.f32 %v174_v6 }
 0x1d8   :  { %178 = vmin.xlane.f32.xlu1 %v177_v3 }
 0x1dc   :  { %215 = vadd.xlane.f32.xlu1 %v214_v5 }
 0x265   :  { %v179_v7 = vpop.xlane.xlu1 %178 }
 0x266   :  { %vm180_vm4 = vcmp.eq.f32.partialorder %v177_v3, %v179_v7 }
 0x267   :  { %v181_v9 = vsel %vm180_vm4, %v176_v8, inf }
 0x268   :  { %182 = vmin.xlane.f32.xlu0 %v181_v9 }
 0x269   :  { %v216_v10 = vpop.xlane.xlu1 %215 }
 0x26a   :  { %v217_v11 = vrot.slane %v216_v10, 4 }
 0x26c   :  { %v218_v12 = vadd.f32 %v217_v11, %v216_v10 }
 0x26e   :  { %v219_v13 = vrot.slane %v218_v12, 2 }
 0x270   :  { %v220_v14 = vadd.f32 %v219_v13, %v218_v12 }
 0x272   :  { %v221_v15 = vrot.slane %v220_v14, 1 }
 0x274   :  { %v222_v16 = vadd.f32 %v221_v15, %v220_v14 }
 0x276   :  { %320 = vpush %v222_v16 }
 0x2a7   :  { %s321_s24 = spop %320 }
 0x2a8   :  { %v226_v17 = vstv %s321_s24 }
 0x2a9   :  { %v227_v18 = vsel %vm225_vm7, %v226_v17, 0.0 }
 0x2aa   :  { %228 = vst [vmem:[#allocation11] sm:$0xff] %v227_v18 }
 0x2ab   :  { %386 = shalt.err (!%p383_p6)
}
 0x2ac   :  { %s387_s28 = scalar_lea.hbm %s632_s6, 128 }
 0x2ad   :  { %p388_p7 = scmp.ne.s32.totalorder %s632_s6, %s387_s28  ;;  %p391_p8 = scmp.lt.u32.totalorder %s387_s28, %s632_s6 }
 0x2af   :  { %p393_p9 = pnand %p391_p8, %p388_p7 }
 0x2b1   :  { %396 = shalt.err (!%p393_p9)
}
 0x2b2   :  { %268 = dma.vmem_to_hbm [thread:$0]  %s266_s23, 128, %s632_s6, [#allocation12]   ;;  %v185_v19 = vcvt.f32.s32 %v179_v7  ;;  %v480_v25 = vmov 0.0  }
 0x2b3   :  { %s478_s11 = smov [#allocation8]   ;;  %s479_s13 = smov [#allocation7]  }
 0x2b4   :  { %v186_v21 = vshll.u32 %v185_v19, 16  ;;  %s245_s12 = sshll.u32 %s478_s11, 4  ;;  %s235_s14 = sshll.u32 %s479_s13, 4  ;;  %s246_s12 = int_to_ptr.vmem [resolvable:$true] %s245_s12  ;;  %s579_s14 = int_to_ptr.vmem [resolvable:$true] %s235_s14 }
 0x2b5   :  { %s397_s6 = scalar_lea.vmem %s246_s12, 128  ;;  %p402_p11 = scmp.lt.s32.totalorder %s246_s12, %s246_s12 }
 0x2b6   :  { %p398_p10 = scmp.ne.s32.totalorder %s246_s12, %s397_s6  ;;  %p403_p12 = scmp.lt.s32.totalorder %s397_s6, %s397_s6 }
 0x2b8   :  { %p404_p13 = por %p403_p12, %p402_p11 }
 0x2ba   :  { %p405_p0 = pnand %p404_p13, %p398_p10 }
 0x2f5   :  { %v183_v20 = vpop.xlane.xlu0 %182 }
 0x2f6   :  { %v184_v22 = vcvt.f32.s32 %v183_v20 }
 0x2f8   :  { %v187_v23 = vadd.s32 %v186_v21, %v184_v22 }
 0x2fa   :  { %vm194_vm8 = vcmp.eq.s32.totalorder %v551_v56, %v187_v23  ;;  %v201_v24 = vsel %vm193_vm2, %v187_v23, 0 }
 0x2fb   :  { %v287_v26 = vsel %vm194_vm8, 1.0, %v480_v25  ;;  %202 = vst [vmem:[#allocation8] sm:$0xff] %v201_v24 }
 0x2fc   :  { %408 = shalt.err (!%p405_p0)
}
 0x2fd   :  { %s409_s17 = scalar_lea.hbm %s630_s4, 128 }
 0x2fe   :  { %p410_p1 = scmp.ne.s32.totalorder %s630_s4, %s409_s17  ;;  %p413_p2 = scmp.lt.u32.totalorder %s409_s17, %s630_s4 }
 0x300   :  { %p415_p3 = pnand %p413_p2, %p410_p1 }
 0x302   :  { %418 = shalt.err (!%p415_p3)
}
 0x303   :  { %248 = dma.vmem_to_hbm [thread:$0]  %s246_s12, 128, %s630_s4, [#allocation9]   ;;  %v199_v27 = vsel %vm193_vm2, %v287_v26, 0.0 }
 0x304   :  { %200 = vst [vmem:[#allocation7] sm:$0xff] %v199_v27  ;;  %v203_v28 = vrot.slane %v199_v27, 4  ;;  %s419_s22 = scalar_lea.vmem %s579_s14, 128  ;;  %p424_p5 = scmp.lt.s32.totalorder %s579_s14, %s579_s14 }
 0x305   :  { %p420_p4 = scmp.ne.s32.totalorder %s579_s14, %s419_s22  ;;  %p425_p6 = scmp.lt.s32.totalorder %s419_s22, %s419_s22 }
 0x307   :  { %p426_p7 = por %p425_p6, %p424_p5 }
 0x309   :  { %p427_p8 = pnand %p426_p7, %p420_p4 }
 0x30b   :  { %430 = shalt.err (!%p427_p8)
}
 0x30c   :  { %s431_s24 = scalar_lea.hbm %s629_s3, 128 }
 0x30d   :  { %p432_p9 = scmp.ne.s32.totalorder %s629_s3, %s431_s24  ;;  %p435_p10 = scmp.lt.u32.totalorder %s431_s24, %s629_s3 }
 0x30f   :  { %p437_p11 = pnand %p435_p10, %p432_p9 }
 0x311   :  { %440 = shalt.err (!%p437_p11)
}
 0x312   :  { %238 = dma.vmem_to_hbm [thread:$0]  %s579_s14, 128, %s629_s3, [#allocation4]   ;;  %v204_v29 = vadd.f32 %v203_v28, %v199_v27 }
 0x313   :  { %s481_s30 = smov [#allocation10]  }
 0x314   :  { %v205_v30 = vrot.slane %v204_v29, 2  ;;  %s255_s7 = sshll.u32 %s481_s30, 4  ;;  %s256_s7 = int_to_ptr.vmem [resolvable:$true] %s255_s7 }
 0x315   :  { %s441_s8 = scalar_lea.vmem %s256_s7, 128  ;;  %p446_p13 = scmp.lt.s32.totalorder %s256_s7, %s256_s7 }
 0x316   :  { %v206_v31 = vadd.f32 %v205_v30, %v204_v29  ;;  %p442_p12 = scmp.ne.s32.totalorder %s256_s7, %s441_s8  ;;  %p447_p0 = scmp.lt.s32.totalorder %s441_s8, %s441_s8 }
 0x318   :  { %v207_v32 = vrot.slane %v206_v31, 1  ;;  %p448_p1 = por %p447_p0, %p446_p13 }
 0x31a   :  { %v208_v33 = vadd.f32 %v207_v32, %v206_v31  ;;  %p449_p2 = pnand %p448_p1, %p442_p12 }
 0x31c   :  { %v210_v34 = vsel %vm209_vm5, %v208_v33, 0.0 }
 0x31d   :  { %211 = vst [vmem:[#allocation10] sm:$0xff] %v210_v34 }
 0x31e   :  { %452 = shalt.err (!%p449_p2)
}
 0x31f   :  { %s453_s10 = scalar_lea.hbm %s631_s5, 128 }
 0x320   :  { %p454_p3 = scmp.ne.s32.totalorder %s631_s5, %s453_s10  ;;  %p457_p4 = scmp.lt.u32.totalorder %s453_s10, %s631_s5 }
 0x322   :  { %p459_p5 = pnand %p457_p4, %p454_p3 }
 0x324   :  { %462 = shalt.err (!%p459_p5)
}
 0x325   :  { %258 = dma.vmem_to_hbm [thread:$0]  %s256_s7, 128, %s631_s5, [#allocation9]  }
 0x326   :  { %467 = dma.done.wait [#allocation4], 128  }
 0x327   :  { %468 = vsyncadd [#allocation4], 4294967168 }
 0x328   :  { %469 = dma.done.wait [#allocation9], 256  }
 0x329   :  { %470 = vsyncadd [#allocation9], 4294967040 }
 0x32a   :  { %471 = dma.done.wait [#allocation12], 128  }
 0x32b   :  { %472 = vsyncadd [#allocation12], 4294967168 }
 0x32c   :  { %281 = vsyncpa [#allocation3], 1 }
 0x32d   :  { %282 = vsyncpa [#allocation6], 1 }
 0x32e   :  { %283 = vsyncpa [#allocation4], 1 }
 0x32f   :  { %284 = vsyncpa [#allocation9], 1 }
 0x330   :  { %285 = vsyncpa [#allocation12], 1 }

</bundles_post_ra>
